<compile_context>
chip_gen: v6e
topology: v6e:2x2x1
jax: 0.10.0
libtpu: 0.0.40
codegen_flags: <defaults>
</compile_context>

<pallas_src>
import jax
import jax.numpy as jnp
from jax import lax
from jax.experimental import pallas as pl
from jax.experimental.pallas import tpu as pltpu


def _round_up(x, m):
    return ((x + m - 1) // m) * m


def _cdiv(a, b):
    return -(-a // b)


def _chip_config():
    """Generation-aware VMEM budgets and megacore handling.

    v5e/v6e: 128 MiB physical VMEM, 1 TensorCore -> big tiles, no forced split.
    v7x:      64 MiB physical VMEM, 2 TensorCores -> conservative tiles, keep
              >= 2 'parallel' grid steps so both cores get work.
    Unknown chips fall back to the conservative (v7x-safe) settings.
    """
    vmem_phys = None
    try:
        vmem_phys = int(pltpu.get_tpu_info().vmem_capacity_bytes)
    except Exception:
        pass
    kind = ""
    try:
        kind = jax.devices()[0].device_kind.lower()
    except Exception:
        pass
    two_cores = ("v7" in kind) or ("7x" in kind)
    if vmem_phys is None:
        vmem_phys = (128 << 20) if (("v5" in kind or "v6" in kind) and not two_cores) else (64 << 20)
    vmem_budget = max(12 << 20, (3 * vmem_phys) // 8)            # block-sizing budget
    vmem_limit = min(max(32 << 20, vmem_phys // 2), 96 << 20)    # scoped-VMEM limit
    return vmem_budget, vmem_limit, two_cores


def _pick_lane_tile(total_lanes, ck_pad, co_pad, in_bytes, vmem_budget,
                    allow_single_step, max_tile=65536):
    """Largest 128-multiple lane tile whose double-buffered footprint fits the
    VMEM budget. The budget, not an artificial cap, is the binding constraint."""
    total_r = _round_up(max(total_lanes, 1), 128)
    # Per-lane-column cost: double-buffered x tile + double-buffered f32 out tile.
    per_lane = 2 * ck_pad * in_bytes + 2 * co_pad * 4
    # Grid-invariant weight/bias blocks (double-buffered). NOTE: they could be
    # single-buffered via pipeline_mode=pl.Buffered(1); at these channel counts
    # that frees a negligible amount of VMEM, so we just charge it to the budget.
    fixed = 2 * co_pad * ck_pad * in_bytes + 2 * co_pad * 4
    tile = max(128, ((max(vmem_budget - fixed, 0) // per_lane) // 128) * 128)
    tile = min(tile, max_tile, total_r)
    # Only force >= 2 grid steps when a second TensorCore can actually use them.
    if (not allow_single_step) and total_r >= 256 and _cdiv(total_r, tile) < 2:
        tile = max(128, ((total_r // 2) // 128) * 128)
    return tile


def _conv_block_kernel(x_ref, w_ref, b_ref, o_ref):
    # x_ref : (CK_pad, T)       pooled im2col tile (compute dtype)
    # w_ref : (CO_pad, CK_pad)  conv weights as a matrix (compute dtype)
    # b_ref : (CO_pad, 1)       bias, f32
    # o_ref : (CO_pad, T)       f32 output tile (lane-dense, 128-multiple)
    y = jnp.dot(w_ref[...], x_ref[...], preferred_element_type=jnp.float32)
    o_ref[...] = (y + b_ref[...]).astype(o_ref.dtype)


def conv_block_forward(x, weight, bias, *, stride, padding,
                       compute_dtype=jnp.bfloat16):
    """x: (N, C_in, L) f32; weight: (C_out, C_in, K) f32; bias: (C_out,) f32."""
    n, c_in, length = x.shape
    c_out, _, k = weight.shape

    l_out = (length + 2 * padding - k) // stride + 1
    l_pool = l_out // 3  # AvgPool1d(kernel=3, stride=3, padding=0), floor mode
    if l_pool <= 0:
        return jnp.zeros((n, c_out, 0), jnp.float32)

    # ---- glue (jit-fused XLA): pad + im2col gather at pooled positions, with
    # the avg-pool folded in BEFORE the contraction (exact for linear conv+bias).
    x_pad = jnp.pad(x.astype(jnp.float32), ((0, 0), (0, 0), (padding, padding)))
    tap = stride * jnp.arange(3 * l_pool)[None, :] + jnp.arange(k)[:, None]   # (K, 3*L_pool)
    x_col = x_pad[:, :, tap]                                                  # (N, C_in, K, 3*L_pool)
    x_col = x_col.reshape(n, c_in, k, l_pool, 3).mean(axis=-1)                # (N, C_in, K, L_pool)

    ck = c_in * k
    in_bytes = jnp.dtype(compute_dtype).itemsize
    # dtype-aware sublane packing: f32 -> 8, bf16 -> 16, 8-bit -> 32
    sub = 8 if in_bytes >= 4 else (16 if in_bytes == 2 else 32)
    ck_pad = _round_up(ck, sub)
    co_pad = _round_up(c_out, sub)

    vmem_budget, vmem_limit, two_cores = _chip_config()

    w_mat = jnp.pad(weight.reshape(c_out, ck),
                    ((0, co_pad - c_out), (0, ck_pad - ck))).astype(compute_dtype)
    b_col = jnp.pad(bias.astype(jnp.float32), (0, co_pad - c_out)).reshape(co_pad, 1)

    # Batched path (kills both wrapper transposes) only when per-batch lane
    # tiles stay wide; otherwise collapse batch into the lane axis.
    batched = l_pool >= 512
    lanes = l_pool if batched else n * l_pool
    allow_single_step = (not two_cores) or (batched and n >= 2)
    lane_tile = _pick_lane_tile(lanes, ck_pad, co_pad, in_bytes,
                                vmem_budget, allow_single_step)
    l_pad = _round_up(lanes, lane_tile)

    if batched:
        x_in = jnp.pad(x_col.reshape(n, ck, l_pool),
                       ((0, 0), (0, ck_pad - ck), (0, l_pad - l_pool))).astype(compute_dtype)
        grid = (n, l_pad // lane_tile)
        in_specs = [
            pl.BlockSpec((None, ck_pad, lane_tile), lambda b, i: (b, 0, i)),
            pl.BlockSpec((co_pad, ck_pad), lambda b, i: (0, 0)),
            pl.BlockSpec((co_pad, 1), lambda b, i: (0, 0)),
        ]
        out_specs = pl.BlockSpec((None, co_pad, lane_tile), lambda b, i: (b, 0, i))
        out_shape = jax.ShapeDtypeStruct((n, co_pad, l_pad), jnp.float32)
        dim_sem = ("parallel", "parallel")
        out_bytes = n * co_pad * l_pad * 4
    else:
        x_in = jnp.transpose(x_col.reshape(n, ck, l_pool), (1, 0, 2)).reshape(ck, n * l_pool)
        x_in = jnp.pad(x_in, ((0, ck_pad - ck), (0, l_pad - n * l_pool))).astype(compute_dtype)
        grid = (l_pad // lane_tile,)
        in_specs = [
            pl.BlockSpec((ck_pad, lane_tile), lambda i: (0, i)),
            pl.BlockSpec((co_pad, ck_pad), lambda i: (0, 0)),
            pl.BlockSpec((co_pad, 1), lambda i: (0, 0)),
        ]
        out_specs = pl.BlockSpec((co_pad, lane_tile), lambda i: (0, i))
        out_shape = jax.ShapeDtypeStruct((co_pad, l_pad), jnp.float32)
        dim_sem = ("parallel",)
        out_bytes = co_pad * l_pad * 4

    cost = pl.CostEstimate(
        flops=2 * c_out * ck * n * l_pool,
        transcendentals=0,
        bytes_accessed=(x_in.size * in_bytes + w_mat.size * in_bytes
                        + b_col.size * 4 + out_bytes),
    )

    out = pl.pallas_call(
        _conv_block_kernel,
        out_shape=out_shape,
        grid_spec=pltpu.PrefetchScalarGridSpec(
            num_scalar_prefetch=0,
            grid=grid,
            in_specs=in_specs,
            out_specs=out_specs,
        ),
        compiler_params=pltpu.CompilerParams(
            dimension_semantics=dim_sem,
            vmem_limit_bytes=vmem_limit,
        ),
        cost_estimate=cost,
    )(x_in, w_mat, b_col)

    if batched:
        return out[:, :c_out, :l_pool]                       # already (N, C_out, L_pool)
    out = out[:c_out, :n * l_pool].reshape(c_out, n, l_pool)
    return jnp.transpose(out, (1, 0, 2))                     # (N, C_out, L_pool)


def _reference_forward(x, weight, bias, *, stride, padding):
    """Pure-JAX reference (lax conv + avg pool) for verification."""
    y = lax.conv_general_dilated(
        x, weight,
        window_strides=(stride,),
        padding=[(padding, padding)],
        dimension_numbers=("NCH", "OIH", "NCH"),
    ) + bias[None, :, None]
    l_pool = y.shape[2] // 3
    y = y[:, :, : 3 * l_pool].reshape(y.shape[0], y.shape[1], l_pool, 3)
    return y.mean(axis=-1)


if __name__ == "__main__":
    key = jax.random.PRNGKey(0)

    def init_params(pkey, c_in, c_out, ksz):
        kw, kb = jax.random.split(pkey)
        bound = 1.0 / (c_in * ksz) ** 0.5
        w = jax.random.uniform(kw, (c_out, c_in, ksz), jnp.float32, -bound, bound)
        b = jax.random.uniform(kb, (c_out,), jnp.float32, -bound, bound)
        return w, b

    conv_block = jax.jit(conv_block_forward,
                         static_argnames=("stride", "padding", "compute_dtype"))

    k1, k2, k3, k4, k5, k6 = jax.random.split(key, 6)

    # --- Test 1: small config (matches module defaults), f32 MXU inputs.
    w1, b1 = init_params(k1, 4, 8, 3)
    x1 = jax.random.normal(k2, (2, 4, 24), jnp.float32)
    out1 = jax.block_until_ready(
        conv_block(x1, w1, b1, stride=1, padding=1, compute_dtype=jnp.float32))
    ref1 = _reference_forward(x1, w1, b1, stride=1, padding=1)
    assert out1.shape == ref1.shape, (out1.shape, ref1.shape)
    assert jnp.allclose(out1, ref1, atol=1e-5, rtol=1e-5), "mismatch vs reference (f32)"

    # --- Test 2: collapsed-batch lane-dense grid, default bf16 MXU inputs.
    w2, b2 = init_params(k3, 4, 16, 3)
    x2 = jax.random.normal(k4, (4, 4, 200), jnp.float32)
    out2 = jax.block_until_ready(conv_block(x2, w2, b2, stride=1, padding=1))
    ref2 = _reference_forward(x2, w2, b2, stride=1, padding=1)
    assert out2.shape == ref2.shape, (out2.shape, ref2.shape)
    assert jnp.allclose(out2, ref2, atol=5e-2, rtol=5e-2), "mismatch vs reference (bf16)"

    # --- Test 3: per-batch L_pool >= 512 -> transpose-free batched grid path.
    w3, b3 = init_params(k5, 4, 8, 3)
    x3 = jax.random.normal(k6, (2, 4, 1560), jnp.float32)
    out3 = jax.block_until_ready(conv_block(x3, w3, b3, stride=1, padding=1))
    ref3 = _reference_forward(x3, w3, b3, stride=1, padding=1)
    assert out3.shape == ref3.shape, (out3.shape, ref3.shape)
    assert jnp.allclose(out3, ref3, atol=5e-2, rtol=5e-2), "mismatch vs reference (bf16 batched)"

    print("KERNEL_OK")
</pallas_src>

<mosaic_0001>
module attributes {stable_mosaic.version = 11 : i64} {
  func.func @_conv_block_kernel(%arg0: i32, %arg1: memref<16x128xf32, #tpu.memory_space<vmem>>, %arg2: memref<8x16xf32, #tpu.memory_space<vmem>>, %arg3: memref<8x1xf32, #tpu.memory_space<vmem>>, %arg4: memref<8x128xf32, #tpu.memory_space<vmem>>) attributes {dimension_semantics = [#tpu.dimension_semantics<parallel>], iteration_bounds = array<i64: 1>, scalar_prefetch = 0 : i64, scratch_operands = 0 : i64, tpu.core_type = #tpu.core_type<tc>, window_params = [{transform_indices = @transform_0, window_bounds = array<i64: 16, 128>}, {pipeline_mode = #tpu.pipeline_mode<synchronous>, transform_indices = @transform_1, window_bounds = array<i64: 8, 16>}, {pipeline_mode = #tpu.pipeline_mode<synchronous>, transform_indices = @transform_2, window_bounds = array<i64: 8, 1>}, {transform_indices = @transform_3, window_bounds = array<i64: 8, 128>}]} {
    %c0 = arith.constant 0 : index
    %c0_0 = arith.constant 0 : index
    %0 = vector.load %arg2[%c0, %c0_0] : memref<8x16xf32, #tpu.memory_space<vmem>>, vector<8x16xf32>
    %c0_1 = arith.constant 0 : index
    %c0_2 = arith.constant 0 : index
    %1 = vector.load %arg1[%c0_1, %c0_2] : memref<16x128xf32, #tpu.memory_space<vmem>>, vector<16x128xf32>
    %cst = arith.constant dense<0.000000e+00> : vector<8x128xf32>
    %2 = tpu.matmul %0, %1, %cst {dimension_numbers = #tpu.dot_dimension_numbers<[1], [0], [0], [1], [0, 0, 1, 1], [], []>} : vector<8x16xf32>, vector<16x128xf32>, vector<8x128xf32> -> vector<8x128xf32>
    %c0_3 = arith.constant 0 : index
    %c0_4 = arith.constant 0 : index
    %3 = vector.load %arg3[%c0_3, %c0_4] : memref<8x1xf32, #tpu.memory_space<vmem>>, vector<8x1xf32>
    %4 = vector.broadcast %3 : vector<8x1xf32> to vector<8x128xf32>
    %5 = arith.addf %2, %4 : vector<8x128xf32>
    %c0_5 = arith.constant 0 : index
    %c0_6 = arith.constant 0 : index
    %6 = vector.load %arg4[%c0_5, %c0_6] : memref<8x128xf32, #tpu.memory_space<vmem>>, vector<8x128xf32>
    tpu.vector_store %arg4[%c0_5, %c0_6], %5 {strides = array<i32>} : memref<8x128xf32, #tpu.memory_space<vmem>>, vector<8x128xf32>,
    return
  }
  func.func @transform_0(%arg0: i32) -> (i32, i32) {
    %c0_i32 = arith.constant 0 : i32
    %c0_i32_0 = arith.constant 0 : i32
    return %c0_i32, %arg0 : i32, i32
  }
  func.func @transform_1(%arg0: i32) -> (i32, i32) {
    %c0_i32 = arith.constant 0 : i32
    %c0_i32_0 = arith.constant 0 : i32
    %c0_i32_1 = arith.constant 0 : i32
    return %c0_i32, %c0_i32_0 : i32, i32
  }
  func.func @transform_2(%arg0: i32) -> (i32, i32) {
    %c0_i32 = arith.constant 0 : i32
    %c0_i32_0 = arith.constant 0 : i32
    %c0_i32_1 = arith.constant 0 : i32
    return %c0_i32, %c0_i32_0 : i32, i32
  }
  func.func @transform_3(%arg0: i32) -> (i32, i32) {
    %c0_i32 = arith.constant 0 : i32
    %c0_i32_0 = arith.constant 0 : i32
    return %c0_i32, %arg0 : i32, i32
  }
}

</mosaic_0001>

<bundles_post_ra>
// kernel: conv_block_forward.1
= control target key start
LH: loop header
LB: loop body
LE: loop exit
PB: predicated region body
PF: predicated region fallthrough
CT: control target
= control target key end

     0   :  { %v117_v0 = vmov 0.0   ;;  %vm118_vm0 = vmmov 0   ;;  %vm23_vm1 = vcmask 130048   ;;  %v119_v4 = vmov 0   ;;  %s155_s0 = inlined_call_operand.vmem [shape: f32[16,128], index: 0, kind: input, shape index: {}]   ;;  %s156_s1 = inlined_call_operand.vmem [shape: f32[8,16], index: 1, kind: input, shape index: {}]   ;;  %s157_s2 = inlined_call_operand.vmem [shape: f32[8,1], index: 2, kind: input, shape index: {}]   ;;  %s158_s3 = inlined_call_operand.vmem [shape: f32[8,128], index: 3, kind: output, shape index: {}]  }
   0x1   :  { %106 = vmatprep.subr.mxu0 %v117_v0  ;;  %v16_v1 = vld [vmem:[%s155_s0 + $0x8] sm:$0xff]  ;;  %v15_v2 = vld [vmem:[%s155_s0] sm:$0xff]  ;;  %110 = vmatprep.mubr.msk.f32.mxu0 %vm118_vm0, %v117_v0 }
   0x2   :  { %107 = vmatpush3.msra.mxu0 %v16_v1  ;;  %v14_v3 = vld [vmem:[%s156_s1] sm:$0xff]  ;;  %116 = vset.pattern.permute.xlu0 %v119_v4 }
   0x3   :  { %v17_v5 = vld [vmem:[%s157_s2] sm:$0xff]  ;;  %108 = vmatprep.subr.mxu0 %v117_v0 }
   0x4   :  { %20 = vperm.xlu0 %116, %v17_v5   ;;  %109 = vmatpush3.msra.mxu0 %v15_v2 }
   0x5   :  { %111 = vmatmul.mubr.msk.f32.vlgmr.msra.gmra.mxu0 %vm23_vm1, %v14_v3 }
  0x7f   :  { %v21_v6 = vpop.permute.xlu0 %20 }
  0xc5   :  { %v93_v7 = vpop.f32.mrf.mxu0 }
  0xc6   :  { %v94_v8 = vadd.f32 %v93_v7, %v21_v6 }
  0xc7   :  { %v112_v9 = vpop.f32.mrf.mxu0 }
  0xc8   :  { %97 = vst [vmem:[%s158_s3] sm:$0xff] %v94_v8 }

</bundles_post_ra>
